<compile_context>
chip_gen: v5e
topology: v5e:2x2
jax: 0.10.0
libtpu: 0.0.40
codegen_flags: <defaults>
</compile_context>

<pallas_src>
import functools
import math

import jax
import jax.numpy as jnp
from jax.experimental import pallas as pl
from jax.experimental.pallas import tpu as pltpu


def _round_up(x, m):
    return (x + m - 1) // m * m


def _default_vmem_limit():
    """Per-generation vmem_limit_bytes: ~100 MiB on 128-MiB parts (v5e/v6e),
    ~56 MiB on 64-MiB parts (v7x). Conservative fallback if the query fails."""
    cap = 64 << 20
    try:
        cap = int(getattr(pltpu.get_tpu_info(), "vmem_capacity_bytes", cap))
    except Exception:
        pass
    return (100 << 20) if cap >= (128 << 20) else (56 << 20)


def _choose_block_cols(Kp, Hp, vmem_limit, tb_cap=512):
    """Largest hidden-column block Hc (multiple of 128 dividing Hp) whose
    working set fits the VMEM budget. Hc == Hp => weights fully resident
    (single-buffered); Hc < Hp => weights stream over the column grid axis
    (double-buffered). E.g. at H=I=2048 the full bf16 weight slab is ~86 MiB,
    which does NOT fit v7x's 64 MiB — this picks a smaller Hc automatically."""
    budget = int(vmem_limit * 0.85)
    nblk = Hp // 128
    for d in range(nblk, 0, -1):
        if nblk % d:
            continue
        hc = d * 128
        resident = hc == Hp
        w_bytes = Kp * 5 * hc * 2 * (1 if resident else 2)   # bf16 weights
        act_bytes = tb_cap * Kp * 2 * 2                      # [x|h|1] tile, 2 bufs
        io_bytes = (tb_cap * hc * 4                          # c tile
                    + tb_cap * 2 * hc * 2                    # [ht|st] bf16 out
                    + tb_cap * hc * 4) * 2                   # ct f32 out, 2 bufs
        scratch = tb_cap * 5 * hc * 4                        # f32 gates slab
        if w_bytes + act_bytes + io_bytes + scratch <= budget:
            return hc
    return 128


def init_params(key, input_size, hidden_size):
    """PyTorch-equivalent params (uniform +/- 1/sqrt(fan)), already transposed."""
    ks = jax.random.split(key, 8)
    k_lstm = 1.0 / math.sqrt(hidden_size)
    k_xg = 1.0 / math.sqrt(input_size)
    k_hg = 1.0 / math.sqrt(hidden_size)

    u = lambda k, shape, bound: jax.random.uniform(
        k, shape, jnp.float32, minval=-bound, maxval=bound
    )

    w_ih = u(ks[0], (4 * hidden_size, input_size), k_lstm)
    w_hh = u(ks[1], (4 * hidden_size, hidden_size), k_lstm)
    b_ih = u(ks[2], (4 * hidden_size,), k_lstm)
    b_hh = u(ks[3], (4 * hidden_size,), k_lstm)
    w_xg = u(ks[4], (hidden_size, input_size), k_xg)
    b_xg = u(ks[5], (hidden_size,), k_xg)
    w_hg = u(ks[6], (hidden_size, hidden_size), k_hg)
    b_hg = u(ks[7], (hidden_size,), k_hg)

    return {
        "w_ih_t": w_ih.T,                                   # (I, 4H)
        "w_hh_t": w_hh.T,                                   # (H, 4H)
        "b_lstm": (b_ih + b_hh).reshape(1, 4 * hidden_size),
        "w_xg_t": w_xg.T,                                   # (I, H)
        "w_hg_t": w_hg.T,                                   # (H, H)
        "b_gate": (b_xg + b_hg).reshape(1, hidden_size),
    }


def pack_params(params, input_size, hidden_size, *, vmem_limit_bytes=None):
    """One-time packing: [x|h|1]-rows x gate-interleaved hidden-column blocks.

    Row layout (Kp = Ip + Hp + 128):
        rows [0, I)        : input weights
        rows [Ip, Ip+H)    : hidden weights
        row  Ip+Hp         : biases (activated by the '1' column of [x|h|1])
    Column layout: Hp//Hc blocks of width 5*Hc; block j = [i|f|g|o|s] for the
    hidden range [j*Hc, (j+1)*Hc). All block boundaries are 128-aligned.
    """
    I, H = input_size, hidden_size
    Ip = _round_up(I, 128)
    Hp = _round_up(H, 128)
    Kp = Ip + Hp + 128

    if vmem_limit_bytes is None:
        vmem_limit_bytes = _default_vmem_limit()
    Hc = _choose_block_cols(Kp, Hp, vmem_limit_bytes)
    nj = Hp // Hc

    w = jnp.zeros((Kp, 5, Hp), jnp.float32)
    w_ih_t = params["w_ih_t"]
    w_hh_t = params["w_hh_t"]
    b_lstm = params["b_lstm"].reshape(-1)
    b_gate = params["b_gate"].reshape(-1)

    # PyTorch LSTMCell gate order [i, f, g, o]; sentinel gate is slot 4.
    for k in range(4):
        w = w.at[:I, k, :H].set(w_ih_t[:, k * H : (k + 1) * H])
        w = w.at[Ip : Ip + H, k, :H].set(w_hh_t[:, k * H : (k + 1) * H])
        w = w.at[Ip + Hp, k, :H].set(b_lstm[k * H : (k + 1) * H])
    w = w.at[:I, 4, :H].set(params["w_xg_t"])
    w = w.at[Ip : Ip + H, 4, :H].set(params["w_hg_t"])
    w = w.at[Ip + Hp, 4, :H].set(b_gate)

    # (Kp, 5, nj, Hc) -> (Kp, nj, 5, Hc) -> (Kp, 5*Hp): gate-interleaved blocks.
    w5 = (
        w.reshape(Kp, 5, nj, Hc)
        .transpose(0, 2, 1, 3)
        .reshape(Kp, 5 * Hp)
        .astype(jnp.bfloat16)
    )

    return {
        "w5": w5,                       # (Kp, 5*Hp) bf16
        "ip": Ip,
        "hp": Hp,
        "hc": Hc,
        "vmem_limit": vmem_limit_bytes,
    }


def _adaptive_lstm_kernel(xh_ref, c_ref, w_ref, out_hs_ref, out_c_ref, *, gate_dtype):
    hc = c_ref.shape[-1]

    # Single fused MXU matmul (bias folded into the weight slab via the '1' col).
    gates = jnp.dot(xh_ref[...], w_ref[...], preferred_element_type=jnp.float32)

    # Nonlinearities in gate_dtype (bf16 on v6e/v7x: EUP packed throughput);
    # the ct recurrence stays f32. All slice boundaries are 128-aligned.
    g = gates.astype(gate_dtype)
    i_g = jax.nn.sigmoid(g[:, 0 * hc : 1 * hc])
    f_g = jax.nn.sigmoid(g[:, 1 * hc : 2 * hc])
    g_g = jnp.tanh(g[:, 2 * hc : 3 * hc])
    o_g = jax.nn.sigmoid(g[:, 3 * hc : 4 * hc])
    s_g = jax.nn.sigmoid(g[:, 4 * hc : 5 * hc])

    ct = (
        f_g.astype(jnp.float32) * c_ref[...]
        + i_g.astype(jnp.float32) * g_g.astype(jnp.float32)
    )
    tanh_ct = jnp.tanh(ct.astype(gate_dtype))   # single tanh, reused for ht and st
    ht = o_g * tanh_ct
    st = s_g * tanh_ct

    # Lane-aligned, unmasked stores.
    out_hs_ref[:, :hc] = ht.astype(out_hs_ref.dtype)
    out_hs_ref[:, hc:] = st.astype(out_hs_ref.dtype)
    out_c_ref[...] = ct


def adaptive_lstm_cell(inp, states, packed, *, gate_dtype=jnp.bfloat16):
    """Pallas forward of AdaptiveLSTMCell.

    inp: (B, I) f32, states = (h_old, c_old) each (B, H) f32.
    packed: output of pack_params.
    gate_dtype: bf16 (default, best on v6e/v7x) or f32 (use on v5e).
    Returns (ht, ct, st), each (B, H) f32.
    """
    h_old, c_old = states
    B, I = inp.shape
    H = h_old.shape[-1]
    w5 = packed["w5"]
    Kp = w5.shape[0]
    Ip, Hp, Hc = packed["ip"], packed["hp"], packed["hc"]
    nj = Hp // Hc

    # Batch tile: multiple of 16 (bf16 packs 16 sublanes/vreg), capped at 512.
    TB = min(512, _round_up(B, 16))
    Bp = _round_up(B, TB)
    nb = Bp // TB
    # Keep >=2 total grid steps when the batch allows (v7x has 2 TensorCores).
    if nb * nj == 1 and Bp >= 32:
        TB = _round_up((Bp + 1) // 2, 16)
        Bp = _round_up(B, TB)
        nb = Bp // TB

    # One fused, padded [x | h | 1] bf16 slab; cell state stays f32.
    # TODO(synk): when stepping over a sequence, pad/cast once outside the time
    # loop (or fold the time loop into this pallas_call with a grid=(T,...) axis
    # and VMEM-resident h/c scratch) instead of repeating these copies per step.
    xh = jnp.zeros((Bp, Kp), jnp.bfloat16)
    xh = xh.at[:B, :I].set(inp.astype(jnp.bfloat16))
    xh = xh.at[:B, Ip : Ip + H].set(h_old.astype(jnp.bfloat16))
    xh = xh.at[:B, Ip + Hp].set(1.0)                     # bias column
    c_p = jnp.zeros((Bp, Hp), jnp.float32).at[:B, :H].set(c_old)

    # Weight spec: single-buffered when fully resident (constant index_map);
    # default double buffering when streaming column blocks.
    if nj == 1:
        w_spec = pl.BlockSpec(
            (Kp, 5 * Hc), lambda j, b: (0, j), pipeline_mode=pl.Buffered(1)
        )
    else:
        w_spec = pl.BlockSpec((Kp, 5 * Hc), lambda j, b: (0, j))

    grid = (nj, nb)   # weights (axis j) change slowest -> fetched once per block
    out_hs, out_c = pl.pallas_call(
        functools.partial(_adaptive_lstm_kernel, gate_dtype=gate_dtype),
        out_shape=(
            jax.ShapeDtypeStruct((Bp, 2 * Hp), jnp.bfloat16),   # [ht | st] blocks
            jax.ShapeDtypeStruct((Bp, Hp), jnp.float32),        # ct
        ),
        grid=grid,
        in_specs=[
            pl.BlockSpec((TB, Kp), lambda j, b: (b, 0)),        # [x|h|1] batch tile
            pl.BlockSpec((TB, Hc), lambda j, b: (b, j)),        # c tile
            w_spec,                                             # fused weights+bias
        ],
        out_specs=(
            pl.BlockSpec((TB, 2 * Hc), lambda j, b: (b, j)),
            pl.BlockSpec((TB, Hc), lambda j, b: (b, j)),
        ),
        compiler_params=pltpu.CompilerParams(
            dimension_semantics=("parallel", "parallel"),
            vmem_limit_bytes=packed["vmem_limit"],
        ),
    )(xh, c_p, w5)

    # Un-block / un-pad. out_hs column block j = [ht_j | st_j] (each Hc wide).
    hs = out_hs.reshape(Bp, nj, 2, Hc)
    ht = hs[:, :, 0, :].reshape(Bp, Hp)[:B, :H].astype(jnp.float32)
    st = hs[:, :, 1, :].reshape(Bp, Hp)[:B, :H].astype(jnp.float32)
    ct = out_c[:B, :H]
    return ht, ct, st


def _reference(inp, states, params):
    """Pure-JAX f32 reference matching PyTorch AdaptiveLSTMCell semantics."""
    h_old, c_old = states
    H = h_old.shape[-1]
    gates = inp @ params["w_ih_t"] + h_old @ params["w_hh_t"] + params["b_lstm"]
    i = jax.nn.sigmoid(gates[:, :H])
    f = jax.nn.sigmoid(gates[:, H : 2 * H])
    g = jnp.tanh(gates[:, 2 * H : 3 * H])
    o = jax.nn.sigmoid(gates[:, 3 * H :])
    ct = f * c_old + i * g
    ht = o * jnp.tanh(ct)
    sen = jax.nn.sigmoid(
        inp @ params["w_xg_t"] + h_old @ params["w_hg_t"] + params["b_gate"]
    )
    st = sen * jnp.tanh(ct)
    return ht, ct, st


if __name__ == "__main__":
    B, INPUT_SIZE, HIDDEN_SIZE = 8, 32, 32

    key = jax.random.PRNGKey(0)
    k_params, k_x, k_h, k_c = jax.random.split(key, 4)

    params = init_params(k_params, INPUT_SIZE, HIDDEN_SIZE)
    packed = pack_params(params, INPUT_SIZE, HIDDEN_SIZE)   # one-time packing

    inp = jax.random.normal(k_x, (B, INPUT_SIZE), jnp.float32)
    h0 = jax.random.normal(k_h, (B, HIDDEN_SIZE), jnp.float32)
    c0 = jax.random.normal(k_c, (B, HIDDEN_SIZE), jnp.float32)

    ht, ct, st = jax.block_until_ready(adaptive_lstm_cell(inp, (h0, c0), packed))

    ht_r, ct_r, st_r = _reference(inp, (h0, c0), params)
    # bf16 matmul inputs + bf16 gating -> loosened tolerance vs f32 reference.
    assert jnp.allclose(ht, ht_r, atol=3e-2, rtol=3e-2)
    assert jnp.allclose(ct, ct_r, atol=3e-2, rtol=3e-2)
    assert jnp.allclose(st, st_r, atol=3e-2, rtol=3e-2)

    print("KERNEL_OK")
</pallas_src>

<mosaic_0001>
module attributes {stable_mosaic.version = 11 : i64} {
  func.func @_adaptive_lstm_kernel(%arg0: i32, %arg1: i32, %arg2: memref<16x384xbf16, #tpu.memory_space<vmem>>, %arg3: memref<16x128xf32, #tpu.memory_space<vmem>>, %arg4: memref<384x640xbf16, #tpu.memory_space<vmem>>, %arg5: memref<16x256xbf16, #tpu.memory_space<vmem>>, %arg6: memref<16x128xf32, #tpu.memory_space<vmem>>) attributes {dimension_semantics = [#tpu.dimension_semantics<parallel>, #tpu.dimension_semantics<parallel>], iteration_bounds = array<i64: 1, 1>, scalar_prefetch = 0 : i64, scratch_operands = 0 : i64, tpu.core_type = #tpu.core_type<tc>, window_params = [{transform_indices = @transform_0, window_bounds = array<i64: 16, 384>}, {transform_indices = @transform_1, window_bounds = array<i64: 16, 128>}, {pipeline_mode = #tpu.pipeline_mode<synchronous>, transform_indices = @transform_2, window_bounds = array<i64: 384, 640>}, {transform_indices = @transform_3, window_bounds = array<i64: 16, 256>}, {transform_indices = @transform_4, window_bounds = array<i64: 16, 128>}]} {
    %c0 = arith.constant 0 : index
    %c0_0 = arith.constant 0 : index
    %0 = vector.load %arg2[%c0, %c0_0] : memref<16x384xbf16, #tpu.memory_space<vmem>>, vector<16x384xbf16>
    %c0_1 = arith.constant 0 : index
    %c0_2 = arith.constant 0 : index
    %1 = vector.load %arg4[%c0_1, %c0_2] : memref<384x640xbf16, #tpu.memory_space<vmem>>, vector<384x640xbf16>
    %cst = arith.constant dense<0.000000e+00> : vector<16x640xf32>
    %2 = tpu.matmul %0, %1, %cst {dimension_numbers = #tpu.dot_dimension_numbers<[1], [0], [0], [1], [0, 0, 1, 1], [], []>} : vector<16x384xbf16>, vector<384x640xbf16>, vector<16x640xf32> -> vector<16x640xf32>
    %3 = arith.truncf %2 : vector<16x640xf32> to vector<16x640xbf16>
    %4 = vector.extract_strided_slice %3 {offsets = [0, 0], sizes = [16, 128], strides = [1, 1]} : vector<16x640xbf16> to vector<16x128xbf16>
    %5 = arith.negf %4 : vector<16x128xbf16>
    %6 = math.exp %5 : vector<16x128xbf16>
    %cst_3 = arith.constant 1.000000e+00 : bf16
    %7 = vector.broadcast %cst_3 : bf16 to vector<16x128xbf16>
    %8 = arith.addf %7, %6 : vector<16x128xbf16>
    %9 = arith.divf %7, %8 : vector<16x128xbf16>
    %10 = vector.extract_strided_slice %3 {offsets = [0, 128], sizes = [16, 128], strides = [1, 1]} : vector<16x640xbf16> to vector<16x128xbf16>
    %11 = arith.negf %10 : vector<16x128xbf16>
    %12 = math.exp %11 : vector<16x128xbf16>
    %cst_4 = arith.constant 1.000000e+00 : bf16
    %13 = vector.broadcast %cst_4 : bf16 to vector<16x128xbf16>
    %14 = arith.addf %13, %12 : vector<16x128xbf16>
    %15 = arith.divf %13, %14 : vector<16x128xbf16>
    %16 = vector.extract_strided_slice %3 {offsets = [0, 256], sizes = [16, 128], strides = [1, 1]} : vector<16x640xbf16> to vector<16x128xbf16>
    %17 = math.tanh %16 : vector<16x128xbf16>
    %18 = vector.extract_strided_slice %3 {offsets = [0, 384], sizes = [16, 128], strides = [1, 1]} : vector<16x640xbf16> to vector<16x128xbf16>
    %19 = arith.negf %18 : vector<16x128xbf16>
    %20 = math.exp %19 : vector<16x128xbf16>
    %cst_5 = arith.constant 1.000000e+00 : bf16
    %21 = vector.broadcast %cst_5 : bf16 to vector<16x128xbf16>
    %22 = arith.addf %21, %20 : vector<16x128xbf16>
    %23 = arith.divf %21, %22 : vector<16x128xbf16>
    %24 = vector.extract_strided_slice %3 {offsets = [0, 512], sizes = [16, 128], strides = [1, 1]} : vector<16x640xbf16> to vector<16x128xbf16>
    %25 = arith.negf %24 : vector<16x128xbf16>
    %26 = math.exp %25 : vector<16x128xbf16>
    %cst_6 = arith.constant 1.000000e+00 : bf16
    %27 = vector.broadcast %cst_6 : bf16 to vector<16x128xbf16>
    %28 = arith.addf %27, %26 : vector<16x128xbf16>
    %29 = arith.divf %27, %28 : vector<16x128xbf16>
    %30 = arith.extf %15 : vector<16x128xbf16> to vector<16x128xf32>
    %c0_7 = arith.constant 0 : index
    %c0_8 = arith.constant 0 : index
    %31 = vector.load %arg3[%c0_7, %c0_8] : memref<16x128xf32, #tpu.memory_space<vmem>>, vector<16x128xf32>
    %32 = arith.mulf %30, %31 : vector<16x128xf32>
    %33 = arith.extf %9 : vector<16x128xbf16> to vector<16x128xf32>
    %34 = arith.extf %17 : vector<16x128xbf16> to vector<16x128xf32>
    %35 = arith.mulf %33, %34 : vector<16x128xf32>
    %36 = arith.addf %32, %35 : vector<16x128xf32>
    %37 = arith.truncf %36 : vector<16x128xf32> to vector<16x128xbf16>
    %38 = math.tanh %37 : vector<16x128xbf16>
    %39 = arith.mulf %23, %38 : vector<16x128xbf16>
    %40 = arith.mulf %29, %38 : vector<16x128xbf16>
    %c0_9 = arith.constant 0 : index
    %c0_10 = arith.constant 0 : index
    %41 = vector.load %arg5[%c0_9, %c0_10] : memref<16x256xbf16, #tpu.memory_space<vmem>>, vector<16x128xbf16>
    tpu.vector_store %arg5[%c0_9, %c0_10], %39 {strides = array<i32>} : memref<16x256xbf16, #tpu.memory_space<vmem>>, vector<16x128xbf16>,
    %c0_11 = arith.constant 0 : index
    %c128 = arith.constant 128 : index
    %42 = vector.load %arg5[%c0_11, %c128] : memref<16x256xbf16, #tpu.memory_space<vmem>>, vector<16x128xbf16>
    tpu.vector_store %arg5[%c0_11, %c128], %40 {strides = array<i32>} : memref<16x256xbf16, #tpu.memory_space<vmem>>, vector<16x128xbf16>,
    %c0_12 = arith.constant 0 : index
    %c0_13 = arith.constant 0 : index
    %43 = vector.load %arg6[%c0_12, %c0_13] : memref<16x128xf32, #tpu.memory_space<vmem>>, vector<16x128xf32>
    tpu.vector_store %arg6[%c0_12, %c0_13], %36 {strides = array<i32>} : memref<16x128xf32, #tpu.memory_space<vmem>>, vector<16x128xf32>,
    return
  }
  func.func @transform_0(%arg0: i32, %arg1: i32) -> (i32, i32) {
    %c0_i32 = arith.constant 0 : i32
    %c0_i32_0 = arith.constant 0 : i32
    return %arg1, %c0_i32 : i32, i32
  }
  func.func @transform_1(%arg0: i32, %arg1: i32) -> (i32, i32) {
    %c0_i32 = arith.constant 0 : i32
    return %arg1, %arg0 : i32, i32
  }
  func.func @transform_2(%arg0: i32, %arg1: i32) -> (i32, i32) {
    %c0_i32 = arith.constant 0 : i32
    %c0_i32_0 = arith.constant 0 : i32
    return %c0_i32, %arg0 : i32, i32
  }
  func.func @transform_3(%arg0: i32, %arg1: i32) -> (i32, i32) {
    %c0_i32 = arith.constant 0 : i32
    return %arg1, %arg0 : i32, i32
  }
  func.func @transform_4(%arg0: i32, %arg1: i32) -> (i32, i32) {
    %c0_i32 = arith.constant 0 : i32
    return %arg1, %arg0 : i32, i32
  }
}

</mosaic_0001>

<bundles_post_ra>
// kernel: tpu_custom_call.1
= control target key start
LH: loop header
LB: loop body
LE: loop exit
PB: predicated region body
PF: predicated region fallthrough
CT: control target
= control target key end

     0   :  { %10 = vsyncpa [#allocation3], 0  ;;  %s2214_s0 = inlined_call_operand.hbm [shape: bf16[16,384], index: 0, kind: input, shape index: {}]   ;;  %s2215_s1 = inlined_call_operand.hbm [shape: f32[16,128], index: 1, kind: input, shape index: {}]   ;;  %s2216_s2 = inlined_call_operand.hbm [shape: bf16[384,640], index: 2, kind: input, shape index: {}]   ;;  %s2217_s3 = inlined_call_operand.hbm [shape: bf16[16,256], index: 3, kind: output, shape index: {0}]   ;;  %s2218_s4 = inlined_call_operand.hbm [shape: f32[16,128], index: 4, kind: output, shape index: {1}]  }
   0x1   :  { %11 = vsyncpa [#allocation6], 0 }
   0x2   :  { %12 = vsyncpa [#allocation4], 0  ;;  %s31_s17 = sshll.u32 %s2215_s1, 4  ;;  %s32_s17 = int_to_ptr.hbm [resolvable:$true] %s31_s17 }
   0x3   :  { %13 = vsyncpa [#allocation10], 0  ;;  %s2112_s18 = smov [#allocation5]   ;;  %s18_s22 = sshll.u32 %s2214_s0, 4  ;;  %s19_s22 = int_to_ptr.hbm [resolvable:$true] %s18_s22 }
   0x4   :  { %s33_s19 = sshll.u32 %s2112_s18, 4  ;;  %s2113_s23 = smov 128   ;;  %s34_s19 = int_to_ptr.vmem [resolvable:$true] %s33_s19 }
   0x5   :  { %s2114_s24 = smov 8   ;;  %s2115_s25 = smov [#allocation2]  }
   0x6   :  { %39 = dma.hbm_to_vmem [thread:$0]  %s32_s17, 256, %s34_s19, [#allocation6], %s2113_s23, %s2113_s23, %s2114_s24  }
   0x7   :  { %s20_s26 = sshll.u32 %s2115_s25, 4  ;;  %s2116_s1 = smov 192   ;;  %s21_s26 = int_to_ptr.vmem [resolvable:$true] %s20_s26 }
   0x8   :  { %s2117_s27 = smov 12   ;;  %s44_s30 = sshll.u32 %s2216_s2, 4  ;;  %s45_s30 = int_to_ptr.hbm [resolvable:$true] %s44_s30 }
   0x9   :  { %26 = dma.hbm_to_vmem [thread:$0]  %s19_s22, 384, %s21_s26, [#allocation3], %s2116_s1, %s2116_s1, %s2117_s27  }
   0xa   :  { %s2118_s5 = smov [#allocation7]   ;;  %s2119_s6 = smov 320  }
   0xb   :  { %s46_s0 = sshll.u32 %s2118_s5, 4  ;;  %s2120_s7 = smov 20   ;;  %s47_s0 = int_to_ptr.vmem [resolvable:$true] %s46_s0 }
   0xc   :  { %52 = dma.hbm_to_vmem [thread:$0]  %s45_s30, 15360, %s47_s0, [#allocation6], %s2119_s6, %s2119_s6, %s2120_s7  }
   0xd   :  { %2104 = dma.done.wait [#allocation3], 384  }
   0xe   :  { %2105 = vsyncadd [#allocation3], 4294966912 }
   0xf   :  { %2106 = dma.done.wait [#allocation6], 15616  }
  0x10   :  { %2107 = vsyncadd [#allocation6], 4294951680  ;;  %v1444_v0 = vld [vmem:[#allocation7 + $0x118] sm:$0xf]  ;;  %v1822_v1 = vld [vmem:[#allocation7 + $0x128] sm:$0xf0] }
  0x11   :  { %v1604_v2 = vld [vmem:[#allocation7 + $0x258] sm:$0xf]  ;;  %v1445_v3 = vor.u32 %v1822_v1, %v1444_v0  ;;  %v1862_v4 = vld [vmem:[#allocation7 + $0x268] sm:$0xf0]  ;;  %v1820_v9 = vld [vmem:[#allocation7 + $0x11c] sm:$0xf] }
  0x12   :  { %v1764_v5 = vld [vmem:[#allocation7 + $0x398] sm:$0xf]  ;;  %v1902_v6 = vld [vmem:[#allocation7 + $0x3a8] sm:$0xf0]  ;;  %v1605_v7 = vor.u32 %v1862_v4, %v1604_v2  ;;  %v1446_v10 = vld [vmem:[#allocation7 + $0x12c] sm:$0xf0] }
  0x13   :  { %v1765_v8 = vor.u32 %v1902_v6, %v1764_v5  ;;  %v1424_v11 = vld [vmem:[#allocation7 + $0xf0] sm:$0xf]  ;;  %854 = vmatpush.bf16.msra.mxu0 %v1445_v3  ;;  %v1449_v12 = vor.u32 %v1820_v9, %v1446_v10  ;;  %v1817_v13 = vld [vmem:[#allocation7 + $0x100] sm:$0xf0]  ;;  %v1815_v20 = vld [vmem:[#allocation7 + $0xf4] sm:$0xf] }
  0x14   :  { %v1584_v14 = vld [vmem:[#allocation7 + $0x230] sm:$0xf]  ;;  %v1857_v15 = vld [vmem:[#allocation7 + $0x240] sm:$0xf0]  ;;  %868 = vmatpush.bf16.msra.mxu1 %v1605_v7  ;;  %v1425_v16 = vor.u32 %v1817_v13, %v1424_v11  ;;  %v1426_v22 = vld [vmem:[#allocation7 + $0x104] sm:$0xf0] }
  0x15   :  { %882 = vmatpush.bf16.msra.mxu2 %v1765_v8  ;;  %v1585_v17 = vor.u32 %v1857_v15, %v1584_v14  ;;  %v1744_v18 = vld [vmem:[#allocation7 + $0x370] sm:$0xf]  ;;  %v1897_v19 = vld [vmem:[#allocation7 + $0x380] sm:$0xf0]  ;;  %896 = vmatpush.bf16.msra.mxu3 %v1449_v12  ;;  %v1404_v23 = vld [vmem:[#allocation7 + $0xc8] sm:$0xf]  ;;  %v1429_v25 = vor.u32 %v1815_v20, %v1426_v22 }
  0x16   :  { %v1745_v21 = vor.u32 %v1897_v19, %v1744_v18  ;;  %v1812_v24 = vld [vmem:[#allocation7 + $0xd8] sm:$0xf0]  ;;  %v1564_v26 = vld [vmem:[#allocation7 + $0x208] sm:$0xf]  ;;  %v1810_v31 = vld [vmem:[#allocation7 + $0xcc] sm:$0xf] }
  0x17   :  { %v1852_v27 = vld [vmem:[#allocation7 + $0x218] sm:$0xf0]  ;;  %v1724_v28 = vld [vmem:[#allocation7 + $0x348] sm:$0xf]  ;;  %855 = vmatpush.bf16.msra.mxu0 %v1425_v16  ;;  %v1405_v29 = vor.u32 %v1812_v24, %v1404_v23  ;;  %v1406_v32 = vld [vmem:[#allocation7 + $0xdc] sm:$0xf0] }
  0x18   :  { %v1892_v30 = vld [vmem:[#allocation7 + $0x358] sm:$0xf0]  ;;  %869 = vmatpush.bf16.msra.mxu1 %v1585_v17  ;;  %v1565_v33 = vor.u32 %v1852_v27, %v1564_v26  ;;  %v1384_v35 = vld [vmem:[#allocation7 + $0xa0] sm:$0xf]  ;;  %v1807_v36 = vld [vmem:[#allocation7 + $0xb0] sm:$0xf0]  ;;  %v1409_v38 = vor.u32 %v1810_v31, %v1406_v32 }
  0x19   :  { %883 = vmatpush.bf16.msra.mxu2 %v1745_v21  ;;  %v1725_v34 = vor.u32 %v1892_v30, %v1724_v28  ;;  %v1544_v37 = vld [vmem:[#allocation7 + $0x1e0] sm:$0xf]  ;;  %897 = vmatpush.bf16.msra.mxu3 %v1429_v25  ;;  %v1847_v39 = vld [vmem:[#allocation7 + $0x1f0] sm:$0xf0]  ;;  %v1805_v42 = vld [vmem:[#allocation7 + $0xa4] sm:$0xf]  ;;  %v1385_v44 = vor.u32 %v1807_v36, %v1384_v35 }
  0x1a   :  { %v1704_v40 = vld [vmem:[#allocation7 + $0x320] sm:$0xf]  ;;  %v1887_v41 = vld [vmem:[#allocation7 + $0x330] sm:$0xf0]  ;;  %v1386_v43 = vld [vmem:[#allocation7 + $0xb4] sm:$0xf0]  ;;  %v1545_v45 = vor.u32 %v1847_v39, %v1544_v37 }
  0x1b   :  { %856 = vmatpush.bf16.msra.mxu0 %v1405_v29  ;;  %v1705_v46 = vor.u32 %v1887_v41, %v1704_v40  ;;  %v1364_v47 = vld [vmem:[#allocation7 + $0x78] sm:$0xf]  ;;  %v1802_v48 = vld [vmem:[#allocation7 + $0x88] sm:$0xf0]  ;;  %v1389_v50 = vor.u32 %v1805_v42, %v1386_v43  ;;  %v1800_v54 = vld [vmem:[#allocation7 + $0x7c] sm:$0xf] }
  0x1c   :  { %870 = vmatpush.bf16.msra.mxu1 %v1565_v33  ;;  %v1524_v49 = vld [vmem:[#allocation7 + $0x1b8] sm:$0xf]  ;;  %v1842_v51 = vld [vmem:[#allocation7 + $0x1c8] sm:$0xf0]  ;;  %v1366_v55 = vld [vmem:[#allocation7 + $0x8c] sm:$0xf0]  ;;  %v1365_v56 = vor.u32 %v1802_v48, %v1364_v47 }
  0x1d   :  { %884 = vmatpush.bf16.msra.mxu2 %v1725_v34  ;;  %898 = vmatpush.bf16.msra.mxu3 %v1409_v38  ;;  %v1684_v52 = vld [vmem:[#allocation7 + $0x2f8] sm:$0xf]  ;;  %v1882_v53 = vld [vmem:[#allocation7 + $0x308] sm:$0xf0]  ;;  %v1525_v57 = vor.u32 %v1842_v51, %v1524_v49  ;;  %v1344_v59 = vld [vmem:[#allocation7 + $0x50] sm:$0xf]  ;;  %v1369_v62 = vor.u32 %v1800_v54, %v1366_v55 }
  0x1e   :  { %v1685_v58 = vor.u32 %v1882_v53, %v1684_v52  ;;  %v1797_v60 = vld [vmem:[#allocation7 + $0x60] sm:$0xf0]  ;;  %v1504_v61 = vld [vmem:[#allocation7 + $0x190] sm:$0xf]  ;;  %v1795_v2 = vld [vmem:[#allocation7 + $0x54] sm:$0xf] }
  0x1f   :  { %857 = vmatpush.bf16.msra.mxu0 %v1385_v44  ;;  %v1837_v63 = vld [vmem:[#allocation7 + $0x1a0] sm:$0xf0]  ;;  %v1664_v0 = vld [vmem:[#allocation7 + $0x2d0] sm:$0xf]  ;;  %v1346_v3 = vld [vmem:[#allocation7 + $0x64] sm:$0xf0]  ;;  %v1345_v4 = vor.u32 %v1797_v60, %v1344_v59 }
  0x20   :  { %871 = vmatpush.bf16.msra.mxu1 %v1545_v45  ;;  %v1877_v1 = vld [vmem:[#allocation7 + $0x2e0] sm:$0xf0]  ;;  %v1505_v5 = vor.u32 %v1837_v63, %v1504_v61  ;;  %v1324_v7 = vld [vmem:[#allocation7 + $0x28] sm:$0xf]  ;;  %v1792_v8 = vld [vmem:[#allocation7 + $0x38] sm:$0xf0]  ;;  %v1349_v10 = vor.u32 %v1795_v2, %v1346_v3 }
  0x21   :  { %885 = vmatpush.bf16.msra.mxu2 %v1705_v46  ;;  %899 = vmatpush.bf16.msra.mxu3 %v1389_v50  ;;  %v1665_v6 = vor.u32 %v1877_v1, %v1664_v0  ;;  %v1484_v9 = vld [vmem:[#allocation7 + $0x168] sm:$0xf]  ;;  %v1832_v11 = vld [vmem:[#allocation7 + $0x178] sm:$0xf0]  ;;  %v1790_v14 = vld [vmem:[#allocation7 + $0x2c] sm:$0xf]  ;;  %v1325_v16 = vor.u32 %v1792_v8, %v1324_v7 }
  0x22   :  { %v1644_v12 = vld [vmem:[#allocation7 + $0x2a8] sm:$0xf]  ;;  %v1872_v13 = vld [vmem:[#allocation7 + $0x2b8] sm:$0xf0]  ;;  %v1326_v15 = vld [vmem:[#allocation7 + $0x3c] sm:$0xf0]  ;;  %v1485_v19 = vor.u32 %v1832_v11, %v1484_v9 }
  0x23   :  { %858 = vmatpush.bf16.msra.mxu0 %v1365_v56  ;;  %v1304_v17 = vld [vmem:[#allocation7] sm:$0xf]  ;;  %v1787_v18 = vld [vmem:[#allocation7 + $0x10] sm:$0xf0]  ;;  %v1645_v20 = vor.u32 %v1872_v13, %v1644_v12  ;;  %v1329_v24 = vor.u32 %v1790_v14, %v1326_v15  ;;  %v1860_v26 = vld [vmem:[#allocation7 + $0x25c] sm:$0xf] }
  0x24   :  { %872 = vmatpush.bf16.msra.mxu1 %v1525_v57  ;;  %v1464_v21 = vld [vmem:[#allocation7 + $0x140] sm:$0xf]  ;;  %v1827_v22 = vld [vmem:[#allocation7 + $0x150] sm:$0xf0]  ;;  %v1606_v27 = vld [vmem:[#allocation7 + $0x26c] sm:$0xf0]  ;;  %v1305_v31 = vor.u32 %v1787_v18, %v1304_v17 }
  0x25   :  { %886 = vmatpush.bf16.msra.mxu2 %v1685_v58  ;;  %900 = vmatpush.bf16.msra.mxu3 %v1369_v62  ;;  %v1624_v23 = vld [vmem:[#allocation7 + $0x280] sm:$0xf]  ;;  %v1867_v25 = vld [vmem:[#allocation7 + $0x290] sm:$0xf0]  ;;  %v1900_v28 = vld [vmem:[#allocation7 + $0x39c] sm:$0xf]  ;;  %v1465_v35 = vor.u32 %v1827_v22, %v1464_v21  ;;  %v1609_v39 = vor.u32 %v1860_v26, %v1606_v27 }
  0x26   :  { %v1766_v29 = vld [vmem:[#allocation7 + $0x3ac] sm:$0xf0]  ;;  %v1452_v30 = vld [vmem:[#allocation7 + $0x120] sm:$0xf]  ;;  %v1823_v32 = vld [vmem:[#allocation7 + $0x130] sm:$0xf0]  ;;  %v1625_v36 = vor.u32 %v1867_v25, %v1624_v23 }
  0x27   :  { %859 = vmatpush.bf16.msra.mxu0 %v1345_v4  ;;  %v1785_v33 = vld [vmem:[#allocation7 + $0x4] sm:$0xf]  ;;  %v1306_v34 = vld [vmem:[#allocation7 + $0x14] sm:$0xf0]  ;;  %v1612_v37 = vld [vmem:[#allocation7 + $0x260] sm:$0xf]  ;;  %v1769_v40 = vor.u32 %v1900_v28, %v1766_v29  ;;  %v1453_v42 = vor.u32 %v1823_v32, %v1452_v30 }
  0x28   :  { %873 = vmatpush.bf16.msra.mxu1 %v1505_v5  ;;  %v1863_v38 = vld [vmem:[#allocation7 + $0x270] sm:$0xf0]  ;;  %v1309_v43 = vor.u32 %v1785_v33, %v1306_v34  ;;  %v1586_v44 = vld [vmem:[#allocation7 + $0x244] sm:$0xf0]  ;;  %v1432_v48 = vld [vmem:[#allocation7 + $0xf8] sm:$0xf] }
  0x29   :  { %887 = vmatpush.bf16.msra.mxu2 %v1665_v6  ;;  %901 = vmatpush.bf16.msra.mxu3 %v1349_v10  ;;  %v1855_v41 = vld [vmem:[#allocation7 + $0x234] sm:$0xf]  ;;  %v1746_v46 = vld [vmem:[#allocation7 + $0x384] sm:$0xf0]  ;;  %v1613_v47 = vor.u32 %v1863_v38, %v1612_v37  ;;  %v1818_v49 = vld [vmem:[#allocation7 + $0x108] sm:$0xf0] }
  0x2a   :  { %v1895_v45 = vld [vmem:[#allocation7 + $0x374] sm:$0xf]  ;;  %v1592_v50 = vld [vmem:[#allocation7 + $0x238] sm:$0xf]  ;;  %v1858_v51 = vld [vmem:[#allocation7 + $0x248] sm:$0xf0]  ;;  %v1589_v54 = vor.u32 %v1855_v41, %v1586_v44  ;;  %v1433_v59 = vor.u32 %v1818_v49, %v1432_v48 }
  0x2b   :  { %860 = vmatpush.bf16.msra.mxu0 %v1325_v16  ;;  %v1292_v52 = vld [vmem:[#allocation2] sm:$0xf]  ;;  %v1783_v53 = vld [vmem:[#allocation2 + $0x8] sm:$0xf0]  ;;  %v1749_v55 = vor.u32 %v1895_v45, %v1746_v46  ;;  %v1850_v56 = vld [vmem:[#allocation7 + $0x20c] sm:$0xf]  ;;  %v1593_v63 = vor.u32 %v1858_v51, %v1592_v50 }
  0x2c   :  { %874 = vmatpush.bf16.msra.mxu1 %v1485_v19  ;;  %v1566_v57 = vld [vmem:[#allocation7 + $0x21c] sm:$0xf0]  ;;  %v2161_v58 = vor.u32 %v1783_v53, %v1292_v52  ;;  %v1890_v60 = vld [vmem:[#allocation7 + $0x34c] sm:$0xf]  ;;  %v1782_v62 = vld [vmem:[#allocation2 + $0x4] sm:$0xf] }
  0x2d   :  { %888 = vmatpush.bf16.msra.mxu2 %v1645_v20  ;;  %902 = vmatpush.bf16.msra.mxu3 %v1329_v24  ;;  %v1726_v61 = vld [vmem:[#allocation7 + $0x35c] sm:$0xf0]  ;;  %v1412_v0 = vld [vmem:[#allocation7 + $0xd0] sm:$0xf]  ;;  %v1813_v1 = vld [vmem:[#allocation7 + $0xe0] sm:$0xf0]  ;;  %v1569_v6 = vor.u32 %v1850_v56, %v1566_v57 }
  0x2e   :  { %v1294_v2 = vld [vmem:[#allocation2 + $0xc] sm:$0xf0]  ;;  %v1572_v3 = vld [vmem:[#allocation7 + $0x210] sm:$0xf]  ;;  %v1853_v4 = vld [vmem:[#allocation7 + $0x220] sm:$0xf0]  ;;  %v1729_v7 = vor.u32 %v1890_v60, %v1726_v61  ;;  %v1413_v11 = vor.u32 %v1813_v1, %v1412_v0 }
  0x2f   :  { %861 = vmatpush.bf16.msra.mxu0 %v1305_v31  ;;  %v2164_v5 = vor.u32 %v1782_v62, %v1294_v2  ;;  %v1845_v8 = vld [vmem:[#allocation7 + $0x1e4] sm:$0xf]  ;;  %v1546_v9 = vld [vmem:[#allocation7 + $0x1f4] sm:$0xf0]  ;;  %v1300_v13 = vld [vmem:[#allocation2 + $0x8] sm:$0xf]  ;;  %v1573_v15 = vor.u32 %v1853_v4, %v1572_v3 }
  0x30   :  { %875 = vmatpush.bf16.msra.mxu1 %v1465_v35  ;;  %v1885_v10 = vld [vmem:[#allocation7 + $0x324] sm:$0xf]  ;;  %v1706_v12 = vld [vmem:[#allocation7 + $0x334] sm:$0xf0]  ;;  %v1784_v14 = vld [vmem:[#allocation2 + $0x10] sm:$0xf0]  ;;  %v1549_v21 = vor.u32 %v1845_v8, %v1546_v9 }
  0x31   :  { %889 = vmatpush.bf16.msra.mxu2 %v1625_v36  ;;  %903 = vmatpush.bf16.msra.mxu3 %v1309_v43  ;;  %v1392_v16 = vld [vmem:[#allocation7 + $0xa8] sm:$0xf]  ;;  %v1808_v17 = vld [vmem:[#allocation7 + $0xb8] sm:$0xf0]  ;;  %v2167_v18 = vor.u32 %v1784_v14, %v1300_v13  ;;  %v1709_v22 = vor.u32 %v1885_v10, %v1706_v12  ;;  %v1526_v25 = vld [vmem:[#allocation7 + $0x1cc] sm:$0xf0] }
  0x32   :  { %862 = vmatmul.bf16.vlgmr.msra.gmra.mxu0 %v2161_v58  ;;  %v1552_v19 = vld [vmem:[#allocation7 + $0x1e8] sm:$0xf]  ;;  %v1848_v20 = vld [vmem:[#allocation7 + $0x1f8] sm:$0xf0]  ;;  %v1393_v24 = vor.u32 %v1808_v17, %v1392_v16  ;;  %v1686_v27 = vld [vmem:[#allocation7 + $0x30c] sm:$0xf0] }
  0x33   :  { %910 = vmatpush.bf16.msrb.mxu0 %v1609_v39  ;;  %876 = vmatmul.bf16.vlgmr.msra.gmra.mxu1 %v2164_v5  ;;  %v1840_v23 = vld [vmem:[#allocation7 + $0x1bc] sm:$0xf]  ;;  %v1553_v28 = vor.u32 %v1848_v20, %v1552_v19  ;;  %v1372_v29 = vld [vmem:[#allocation7 + $0x80] sm:$0xf]  ;;  %v1803_v30 = vld [vmem:[#allocation7 + $0x90] sm:$0xf0] }
  0x34   :  { %924 = vmatpush.bf16.msrb.mxu1 %v1769_v40  ;;  %904 = vmatmul.bf16.vlgmr.msra.gmra.mxu3 %v2161_v58  ;;  %v1880_v26 = vld [vmem:[#allocation7 + $0x2fc] sm:$0xf]  ;;  %v1532_v31 = vld [vmem:[#allocation7 + $0x1c0] sm:$0xf]  ;;  %v1843_v32 = vld [vmem:[#allocation7 + $0x1d0] sm:$0xf0]  ;;  %v1529_v33 = vor.u32 %v1840_v23, %v1526_v25  ;;  %v1373_v36 = vor.u32 %v1803_v30, %v1372_v29 }
  0x35   :  { %938 = vmatpush.bf16.msrb.mxu2 %v1453_v42  ;;  %952 = vmatpush.bf16.msrb.mxu3 %v1613_v47  ;;  %v1689_v34 = vor.u32 %v1880_v26, %v1686_v27  ;;  %v1835_v35 = vld [vmem:[#allocation7 + $0x194] sm:$0xf]  ;;  %v1506_v37 = vld [vmem:[#allocation7 + $0x1a4] sm:$0xf0]  ;;  %v1533_v40 = vor.u32 %v1843_v32, %v1532_v31  ;;  %v1352_v41 = vld [vmem:[#allocation7 + $0x58] sm:$0xf] }
  0x36   :  { %890 = vmatmul.bf16.vlgmr.msra.gmra.mxu2 %v2167_v18  ;;  %v1875_v38 = vld [vmem:[#allocation7 + $0x2d4] sm:$0xf]  ;;  %v1666_v39 = vld [vmem:[#allocation7 + $0x2e4] sm:$0xf0]  ;;  %v1798_v42 = vld [vmem:[#allocation7 + $0x68] sm:$0xf0]  ;;  %v1509_v45 = vor.u32 %v1835_v35, %v1506_v37 }
  0x37   :  { %911 = vmatpush.bf16.msrb.mxu0 %v1589_v54  ;;  %v1512_v43 = vld [vmem:[#allocation7 + $0x198] sm:$0xf]  ;;  %v1838_v44 = vld [vmem:[#allocation7 + $0x1a8] sm:$0xf0]  ;;  %v1669_v46 = vor.u32 %v1875_v38, %v1666_v39  ;;  %v1353_v48 = vor.u32 %v1798_v42, %v1352_v41  ;;  %v1486_v49 = vld [vmem:[#allocation7 + $0x17c] sm:$0xf0] }
  0x38   :  { %925 = vmatpush.bf16.msrb.mxu1 %v1749_v55  ;;  %v1830_v47 = vld [vmem:[#allocation7 + $0x16c] sm:$0xf]  ;;  %v1646_v51 = vld [vmem:[#allocation7 + $0x2bc] sm:$0xf0]  ;;  %v1513_v52 = vor.u32 %v1838_v44, %v1512_v43  ;;  %v1332_v53 = vld [vmem:[#allocation7 + $0x30] sm:$0xf] }
  0x39   :  { %939 = vmatpush.bf16.msrb.mxu2 %v1433_v59  ;;  %953 = vmatpush.bf16.msrb.mxu3 %v1593_v63  ;;  %v1870_v50 = vld [vmem:[#allocation7 + $0x2ac] sm:$0xf]  ;;  %v1793_v54 = vld [vmem:[#allocation7 + $0x40] sm:$0xf0]  ;;  %v1492_v55 = vld [vmem:[#allocation7 + $0x170] sm:$0xf]  ;;  %v1489_v57 = vor.u32 %v1830_v47, %v1486_v49 }
  0x3a   :  { %v1833_v56 = vld [vmem:[#allocation7 + $0x180] sm:$0xf0]  ;;  %v1649_v59 = vor.u32 %v1870_v50, %v1646_v51  ;;  %v1466_v61 = vld [vmem:[#allocation7 + $0x154] sm:$0xf0]  ;;  %v1333_v63 = vor.u32 %v1793_v54, %v1332_v53  ;;  %v1312_v1 = vld [vmem:[#allocation7 + $0x8] sm:$0xf] }
  0x3b   :  { %912 = vmatpush.bf16.msrb.mxu0 %v1569_v6  ;;  %v1825_v60 = vld [vmem:[#allocation7 + $0x144] sm:$0xf]  ;;  %v1626_v0 = vld [vmem:[#allocation7 + $0x294] sm:$0xf0]  ;;  %v1788_v2 = vld [vmem:[#allocation7 + $0x18] sm:$0xf0]  ;;  %v1493_v3 = vor.u32 %v1833_v56, %v1492_v55 }
  0x3c   :  { %926 = vmatpush.bf16.msrb.mxu1 %v1729_v7  ;;  %v1865_v62 = vld [vmem:[#allocation7 + $0x284] sm:$0xf]  ;;  %v1772_v4 = vld [vmem:[#allocation7 + $0x3a0] sm:$0xf]  ;;  %v1903_v6 = vld [vmem:[#allocation7 + $0x3b0] sm:$0xf0] }
  0x3d   :  { %940 = vmatpush.bf16.msrb.mxu2 %v1413_v11  ;;  %954 = vmatpush.bf16.msrb.mxu3 %v1573_v15  ;;  %v1821_v7 = vld [vmem:[#allocation7 + $0x124] sm:$0xf]  ;;  %v1454_v8 = vld [vmem:[#allocation7 + $0x134] sm:$0xf0]  ;;  %v1469_v11 = vor.u32 %v1825_v60, %v1466_v61  ;;  %v1629_v12 = vor.u32 %v1865_v62, %v1626_v0  ;;  %v1472_v13 = vld [vmem:[#allocation7 + $0x148] sm:$0xf]  ;;  %v1313_v15 = vor.u32 %v1788_v2, %v1312_v1 }
  0x3e   :  { %v1861_v9 = vld [vmem:[#allocation7 + $0x264] sm:$0xf]  ;;  %v1614_v10 = vld [vmem:[#allocation7 + $0x274] sm:$0xf0]  ;;  %v1828_v14 = vld [vmem:[#allocation7 + $0x158] sm:$0xf0]  ;;  %v1773_v16 = vor.u32 %v1903_v6, %v1772_v4  ;;  %v1457_v20 = vor.u32 %v1821_v7, %v1454_v8 }
  0x3f   :  { %913 = vmatpush.bf16.msrb.mxu0 %v1549_v21  ;;  %v1901_v17 = vld [vmem:[#allocation7 + $0x3a4] sm:$0xf]  ;;  %v1774_v19 = vld [vmem:[#allocation7 + $0x3b4] sm:$0xf0]  ;;  %v1617_v21 = vor.u32 %v1861_v9, %v1614_v10  ;;  %v1898_v23 = vld [vmem:[#allocation7 + $0x388] sm:$0xf0]  ;;  %v1473_v25 = vor.u32 %v1828_v14, %v1472_v13 }
  0x40   :  { %927 = vmatpush.bf16.msrb.mxu1 %v1709_v22  ;;  %v1752_v22 = vld [vmem:[#allocation7 + $0x378] sm:$0xf]  ;;  %v1434_v26 = vld [vmem:[#allocation7 + $0x10c] sm:$0xf0]  ;;  %v1856_v27 = vld [vmem:[#allocation7 + $0x23c] sm:$0xf]  ;;  %v1777_v29 = vor.u32 %v1901_v17, %v1774_v19 }
  0x41   :  { %941 = vmatpush.bf16.msrb.mxu2 %v1393_v24  ;;  %955 = vmatpush.bf16.msrb.mxu3 %v1553_v28  ;;  %v1816_v24 = vld [vmem:[#allocation7 + $0xfc] sm:$0xf]  ;;  %v1594_v28 = vld [vmem:[#allocation7 + $0x24c] sm:$0xf0]  ;;  %v1753_v30 = vor.u32 %v1898_v23, %v1752_v22  ;;  %v1811_v37 = vld [vmem:[#allocation7 + $0xd4] sm:$0xf] }
  0x42   :  { %v1896_v31 = vld [vmem:[#allocation7 + $0x37c] sm:$0xf]  ;;  %v1754_v32 = vld [vmem:[#allocation7 + $0x38c] sm:$0xf0]  ;;  %v1414_v38 = vld [vmem:[#allocation7 + $0xe4] sm:$0xf0] }
  0x43   :  { %914 = vmatpush.bf16.msrb.mxu0 %v1529_v33  ;;  %v1437_v33 = vor.u32 %v1816_v24, %v1434_v26  ;;  %v1732_v35 = vld [vmem:[#allocation7 + $0x350] sm:$0xf]  ;;  %v1851_v39 = vld [vmem:[#allocation7 + $0x214] sm:$0xf]  ;;  %v1757_v41 = vor.u32 %v1896_v31, %v1754_v32  ;;  %v1734_v44 = vld [vmem:[#allocation7 + $0x364] sm:$0xf0] }
  0x44   :  { %928 = vmatpush.bf16.msrb.mxu1 %v1689_v34  ;;  %v1597_v34 = vor.u32 %v1856_v27, %v1594_v28  ;;  %v1891_v43 = vld [vmem:[#allocation7 + $0x354] sm:$0xf]  ;;  %v1712_v47 = vld [vmem:[#allocation7 + $0x328] sm:$0xf]  ;;  %v1806_v49 = vld [vmem:[#allocation7 + $0xac] sm:$0xf] }
  0x45   :  { %942 = vmatpush.bf16.msrb.mxu2 %v1373_v36  ;;  %956 = vmatpush.bf16.msrb.mxu3 %v1533_v40  ;;  %v1893_v36 = vld [vmem:[#allocation7 + $0x360] sm:$0xf0]  ;;  %v1574_v40 = vld [vmem:[#allocation7 + $0x224] sm:$0xf0]  ;;  %v1394_v50 = vld [vmem:[#allocation7 + $0xbc] sm:$0xf0]  ;;  %v1737_v53 = vor.u32 %v1891_v43, %v1734_v44 }
  0x46   :  { %v1733_v42 = vor.u32 %v1893_v36, %v1732_v35  ;;  %v1846_v51 = vld [vmem:[#allocation7 + $0x1ec] sm:$0xf]  ;;  %v1714_v56 = vld [vmem:[#allocation7 + $0x33c] sm:$0xf0]  ;;  %v1883_v61 = vld [vmem:[#allocation7 + $0x310] sm:$0xf0] }
  0x47   :  { %915 = vmatpush.bf16.msrb.mxu0 %v1509_v45  ;;  %v1417_v45 = vor.u32 %v1811_v37, %v1414_v38  ;;  %v1886_v55 = vld [vmem:[#allocation7 + $0x32c] sm:$0xf]  ;;  %v1692_v60 = vld [vmem:[#allocation7 + $0x300] sm:$0xf]  ;;  %v1801_v62 = vld [vmem:[#allocation7 + $0x84] sm:$0xf] }
  0x48   :  { %929 = vmatpush.bf16.msrb.mxu1 %v1669_v46  ;;  %v1577_v46 = vor.u32 %v1851_v39, %v1574_v40  ;;  %v1841_v0 = vld [vmem:[#allocation7 + $0x1c4] sm:$0xf]  ;;  %v1534_v1 = vld [vmem:[#allocation7 + $0x1d4] sm:$0xf0]  ;;  %v1717_v2 = vor.u32 %v1886_v55, %v1714_v56  ;;  %v1878_v10 = vld [vmem:[#allocation7 + $0x2e8] sm:$0xf0] }
  0x49   :  { %943 = vmatpush.bf16.msrb.mxu2 %v1353_v48  ;;  %957 = vmatpush.bf16.msrb.mxu3 %v1513_v52  ;;  %v1888_v48 = vld [vmem:[#allocation7 + $0x338] sm:$0xf0]  ;;  %v1554_v52 = vld [vmem:[#allocation7 + $0x1fc] sm:$0xf0]  ;;  %v1881_v4 = vld [vmem:[#allocation7 + $0x304] sm:$0xf]  ;;  %v1537_v8 = vor.u32 %v1841_v0, %v1534_v1 }
  0x4a   :  { %v1713_v54 = vor.u32 %v1888_v48, %v1712_v47  ;;  %v1694_v6 = vld [vmem:[#allocation7 + $0x314] sm:$0xf0]  ;;  %v1836_v13 = vld [vmem:[#allocation7 + $0x19c] sm:$0xf]  ;;  %v1514_v14 = vld [vmem:[#allocation7 + $0x1ac] sm:$0xf0] }
  0x4b   :  { %916 = vmatpush.bf16.msrb.mxu0 %v1489_v57  ;;  %v1397_v57 = vor.u32 %v1806_v49, %v1394_v50  ;;  %v1672_v9 = vld [vmem:[#allocation7 + $0x2d8] sm:$0xf]  ;;  %v1876_v17 = vld [vmem:[#allocation7 + $0x2dc] sm:$0xf]  ;;  %v1674_v19 = vld [vmem:[#allocation7 + $0x2ec] sm:$0xf0] }
  0x4c   :  { %930 = vmatpush.bf16.msrb.mxu1 %v1649_v59  ;;  %v1557_v59 = vor.u32 %v1846_v51, %v1554_v52  ;;  %v1652_v22 = vld [vmem:[#allocation7 + $0x2b0] sm:$0xf]  ;;  %v1873_v23 = vld [vmem:[#allocation7 + $0x2c0] sm:$0xf0]  ;;  %v1791_v24 = vld [vmem:[#allocation7 + $0x34] sm:$0xf]  ;;  %v1677_v28 = vor.u32 %v1876_v17, %v1674_v19 }
  0x4d   :  { %944 = vmatpush.bf16.msrb.mxu2 %v1333_v63  ;;  %958 = vmatpush.bf16.msrb.mxu3 %v1493_v3  ;;  %v1374_v63 = vld [vmem:[#allocation7 + $0x94] sm:$0xf0]  ;;  %v1693_v3 = vor.u32 %v1883_v61, %v1692_v60  ;;  %v1831_v26 = vld [vmem:[#allocation7 + $0x174] sm:$0xf]  ;;  %v1494_v27 = vld [vmem:[#allocation7 + $0x184] sm:$0xf0] }
  0x4e   :  { %v1377_v7 = vor.u32 %v1801_v62, %v1374_v63  ;;  %v1654_v31 = vld [vmem:[#allocation7 + $0x2c4] sm:$0xf0]  ;;  %v1497_v35 = vor.u32 %v1831_v26, %v1494_v27  ;;  %v1786_v36 = vld [vmem:[#allocation7 + $0xc] sm:$0xf]  ;;  %v1314_v37 = vld [vmem:[#allocation7 + $0x1c] sm:$0xf0] }
  0x4f   :  { %917 = vmatpush.bf16.msrb.mxu0 %v1469_v11  ;;  %v1796_v11 = vld [vmem:[#allocation7 + $0x5c] sm:$0xf]  ;;  %v1632_v32 = vld [vmem:[#allocation7 + $0x288] sm:$0xf]  ;;  %v1826_v38 = vld [vmem:[#allocation7 + $0x14c] sm:$0xf]  ;;  %v1317_v50 = vor.u32 %v1786_v36, %v1314_v37 }
  0x50   :  { %931 = vmatpush.bf16.msrb.mxu1 %v1629_v12  ;;  %v1354_v12 = vld [vmem:[#allocation7 + $0x6c] sm:$0xf0]  ;;  %v1474_v39 = vld [vmem:[#allocation7 + $0x15c] sm:$0xf0]  ;;  %v1460_v40 = vld [vmem:[#allocation7 + $0x128] sm:$0xf] }
  0x51   :  { %945 = vmatpush.bf16.msrb.mxu2 %v1313_v15  ;;  %959 = vmatpush.bf16.msrb.mxu3 %v1473_v25  ;;  %v1697_v15 = vor.u32 %v1881_v4, %v1694_v6  ;;  %v1334_v25 = vld [vmem:[#allocation7 + $0x44] sm:$0xf0]  ;;  %v1864_v44 = vld [vmem:[#allocation7 + $0x278] sm:$0xf0]  ;;  %v1866_v48 = vld [vmem:[#allocation7 + $0x28c] sm:$0xf]  ;;  %v1477_v51 = vor.u32 %v1826_v38, %v1474_v39 }
  0x52   :  { %918 = vmatmul.bf16.vlgmr.msrb.gmra.mxu0 %v2164_v5  ;;  %v1620_v43 = vld [vmem:[#allocation7 + $0x268] sm:$0xf]  ;;  %v1904_v47 = vld [vmem:[#allocation7 + $0x3b8] sm:$0xf0]  ;;  %v1634_v49 = vld [vmem:[#allocation7 + $0x29c] sm:$0xf0] }
  0x53   :  { %966 = vmatpush.bf16.msra.mxu0 %v1773_v16  ;;  %932 = vmatmul.bf16.vlgmr.msrb.gmra.mxu1 %v2167_v18  ;;  %v1673_v16 = vor.u32 %v1878_v10, %v1672_v9  ;;  %v1637_v55 = vor.u32 %v1866_v48, %v1634_v49  ;;  %v1440_v56 = vld [vmem:[#allocation7 + $0x100] sm:$0xf]  ;;  %v1859_v60 = vld [vmem:[#allocation7 + $0x250] sm:$0xf0]  ;;  %v1580_v4 = vld [vmem:[#allocation7 + $0x218] sm:$0xf] }
  0x54   :  { %980 = vmatpush.bf16.msra.mxu1 %v1457_v20  ;;  %946 = vmatmul.bf16.vlgmr.msrb.gmra.mxu2 %v2161_v58  ;;  %v1357_v20 = vor.u32 %v1796_v11, %v1354_v12  ;;  %v1760_v61 = vld [vmem:[#allocation7 + $0x380] sm:$0xf]  ;;  %v1899_v62 = vld [vmem:[#allocation7 + $0x390] sm:$0xf0]  ;;  %v1854_v6 = vld [vmem:[#allocation7 + $0x228] sm:$0xf0] }
  0x55   :  { %994 = vmatpush.bf16.msra.mxu2 %v1617_v21  ;;  %1008 = vmatpush.bf16.msra.mxu3 %v1777_v29  ;;  %v1517_v21 = vor.u32 %v1836_v13, %v1514_v14  ;;  %v1871_v29 = vld [vmem:[#allocation7 + $0x2b4] sm:$0xf]  ;;  %v1761_v1 = vor.u32 %v1899_v62, %v1760_v61  ;;  %v1581_v10 = vor.u32 %v1854_v6, %v1580_v4  ;;  %v1400_v12 = vld [vmem:[#allocation7 + $0xb0] sm:$0xf]  ;;  %v1809_v13 = vld [vmem:[#allocation7 + $0xc0] sm:$0xf0] }
  0x56   :  { %960 = vmatmul.bf16.vlgmr.msrb.gmra.mxu3 %v2164_v5  ;;  %v1560_v14 = vld [vmem:[#allocation7 + $0x1f0] sm:$0xf]  ;;  %v1889_v17 = vld [vmem:[#allocation7 + $0x340] sm:$0xf0]  ;;  %v1401_v19 = vor.u32 %v1809_v13, %v1400_v12  ;;  %v1700_v26 = vld [vmem:[#allocation7 + $0x308] sm:$0xf] }
  0x57   :  { %967 = vmatpush.bf16.msra.mxu0 %v1753_v30  ;;  %v1653_v30 = vor.u32 %v1873_v23, %v1652_v22  ;;  %v1380_v22 = vld [vmem:[#allocation7 + $0x88] sm:$0xf]  ;;  %v1804_v23 = vld [vmem:[#allocation7 + $0x98] sm:$0xf0]  ;;  %v1879_v36 = vld [vmem:[#allocation7 + $0x2f0] sm:$0xf0] }
  0x58   :  { %981 = vmatpush.bf16.msra.mxu1 %v1437_v33  ;;  %v1868_v33 = vld [vmem:[#allocation7 + $0x298] sm:$0xf0]  ;;  %v1320_v49 = vld [vmem:[#allocation7 + $0x10] sm:$0xf]  ;;  %s2122_s2 = smov [#allocation9]   ;;  %s1271_s11 = sshll.u32 %s2218_s4, 4  ;;  %s1272_s11 = int_to_ptr.hbm [resolvable:$true] %s1271_s11 }
  0x59   :  { %995 = vmatpush.bf16.msra.mxu2 %v1597_v34  ;;  %1009 = vmatpush.bf16.msra.mxu3 %v1757_v41  ;;  %v1337_v34 = vor.u32 %v1791_v24, %v1334_v25  ;;  %v1824_v41 = vld [vmem:[#allocation7 + $0x138] sm:$0xf0]  ;;  %v1540_v24 = vld [vmem:[#allocation7 + $0x1c8] sm:$0xf]  ;;  %s1269_s8 = sshll.u32 %s2122_s2, 4  ;;  %s2123_s4 = smov [#allocation8]   ;;  %s1270_s8 = int_to_ptr.vmem [resolvable:$true] %s1269_s8 }
  0x5a   :  { %v1461_v52 = vor.u32 %v1824_v41, %v1460_v40  ;;  %v1844_v25 = vld [vmem:[#allocation7 + $0x1d8] sm:$0xf0]  ;;  %v1340_v40 = vld [vmem:[#allocation7 + $0x38] sm:$0xf]  ;;  %v1794_v41 = vld [vmem:[#allocation7 + $0x48] sm:$0xf0] }
  0x5b   :  { %968 = vmatpush.bf16.msra.mxu0 %v1733_v42  ;;  %v1657_v42 = vor.u32 %v1871_v29, %v1654_v31  ;;  %v1884_v27 = vld [vmem:[#allocation7 + $0x318] sm:$0xf0]  ;;  %v1541_v29 = vor.u32 %v1844_v25, %v1540_v24  ;;  %v1360_v31 = vld [vmem:[#allocation7 + $0x60] sm:$0xf]  ;;  %s1256_s12 = sshll.u32 %s2123_s4, 4  ;;  %s1258_s15 = sshll.u32 %s2217_s3, 4  ;;  %s1257_s12 = int_to_ptr.vmem [resolvable:$true] %s1256_s12  ;;  %s1259_s15 = int_to_ptr.hbm [resolvable:$true] %s1258_s15 }
  0x5c   :  { %982 = vmatpush.bf16.msra.mxu1 %v1417_v45  ;;  %v1780_v45 = vld [vmem:[#allocation7 + $0x3a8] sm:$0xf] }
  0x5d   :  { %996 = vmatpush.bf16.msra.mxu2 %v1577_v46  ;;  %1010 = vmatpush.bf16.msra.mxu3 %v1737_v53  ;;  %v1633_v46 = vor.u32 %v1868_v33, %v1632_v32  ;;  %v1621_v53 = vor.u32 %v1864_v44, %v1620_v43  ;;  %v1799_v32 = vld [vmem:[#allocation7 + $0x70] sm:$0xf0]  ;;  %v1520_v33 = vld [vmem:[#allocation7 + $0x1a0] sm:$0xf]  ;;  %v1834_v43 = vld [vmem:[#allocation7 + $0x188] sm:$0xf0] }
  0x5e   :  { %v1361_v37 = vor.u32 %v1799_v32, %v1360_v31  ;;  %v1660_v44 = vld [vmem:[#allocation7 + $0x2b8] sm:$0xf] }
  0x5f   :  { %969 = vmatpush.bf16.msra.mxu0 %v1713_v54  ;;  %v1781_v54 = vor.u32 %v1904_v47, %v1780_v45  ;;  %v1874_v45 = vld [vmem:[#allocation7 + $0x2c8] sm:$0xf0] }
  0x60   :  { %983 = vmatpush.bf16.msra.mxu1 %v1397_v57  ;;  %v1819_v57 = vld [vmem:[#allocation7 + $0x110] sm:$0xf0]  ;;  %v1661_v48 = vor.u32 %v1874_v45, %v1660_v44 }
  0x61   :  { %997 = vmatpush.bf16.msra.mxu2 %v1557_v59  ;;  %1011 = vmatpush.bf16.msra.mxu3 %v1717_v2  ;;  %v1600_v59 = vld [vmem:[#allocation7 + $0x240] sm:$0xf]  ;;  %v1441_v63 = vor.u32 %v1819_v57, %v1440_v56  ;;  %v1420_v2 = vld [vmem:[#allocation7 + $0xd8] sm:$0xf] }
  0x62   :  { %v1601_v0 = vor.u32 %v1859_v60, %v1600_v59 }
  0x63   :  { %970 = vmatpush.bf16.msra.mxu0 %v1693_v3  ;;  %v1814_v3 = vld [vmem:[#allocation7 + $0xe8] sm:$0xf0] }
  0x64   :  { %984 = vmatpush.bf16.msra.mxu1 %v1377_v7  ;;  %v1740_v7 = vld [vmem:[#allocation7 + $0x358] sm:$0xf]  ;;  %v1421_v9 = vor.u32 %v1814_v3, %v1420_v2 }
  0x65   :  { %998 = vmatpush.bf16.msra.mxu2 %v1537_v8  ;;  %1012 = vmatpush.bf16.msra.mxu3 %v1697_v15  ;;  %v1894_v8 = vld [vmem:[#allocation7 + $0x368] sm:$0xf0]  ;;  %v1849_v15 = vld [vmem:[#allocation7 + $0x200] sm:$0xf0] }
  0x66   :  { %v1741_v11 = vor.u32 %v1894_v8, %v1740_v7 }
  0x67   :  { %971 = vmatpush.bf16.msra.mxu0 %v1673_v16  ;;  %v1720_v16 = vld [vmem:[#allocation7 + $0x330] sm:$0xf] }
  0x68   :  { %985 = vmatpush.bf16.msra.mxu1 %v1357_v20  ;;  %v1561_v20 = vor.u32 %v1849_v15, %v1560_v14 }
  0x69   :  { %999 = vmatpush.bf16.msra.mxu2 %v1517_v21  ;;  %1013 = vmatpush.bf16.msra.mxu3 %v1677_v28  ;;  %v1721_v21 = vor.u32 %v1889_v17, %v1720_v16  ;;  %v1381_v28 = vor.u32 %v1804_v23, %v1380_v22 }
  0x6b   :  { %972 = vmatpush.bf16.msra.mxu0 %v1653_v30  ;;  %v1701_v30 = vor.u32 %v1884_v27, %v1700_v26 }
  0x6c   :  { %986 = vmatpush.bf16.msra.mxu1 %v1337_v34  ;;  %v1839_v34 = vld [vmem:[#allocation7 + $0x1b0] sm:$0xf0] }
  0x6d   :  { %1000 = vmatpush.bf16.msra.mxu2 %v1497_v35  ;;  %1014 = vmatpush.bf16.msra.mxu3 %v1657_v42  ;;  %v1680_v35 = vld [vmem:[#allocation7 + $0x2e0] sm:$0xf]  ;;  %v1521_v38 = vor.u32 %v1839_v34, %v1520_v33  ;;  %v1500_v42 = vld [vmem:[#allocation7 + $0x178] sm:$0xf] }
  0x6e   :  { %v1681_v39 = vor.u32 %v1879_v36, %v1680_v35  ;;  %v1501_v47 = vor.u32 %v1834_v43, %v1500_v42 }
  0x6f   :  { %973 = vmatpush.bf16.msra.mxu0 %v1633_v46  ;;  %v1341_v46 = vor.u32 %v1794_v41, %v1340_v40 }
  0x70   :  { %987 = vmatpush.bf16.msra.mxu1 %v1317_v50  ;;  %v1789_v50 = vld [vmem:[#allocation7 + $0x20] sm:$0xf0] }
  0x71   :  { %1001 = vmatpush.bf16.msra.mxu2 %v1477_v51  ;;  %1015 = vmatpush.bf16.msra.mxu3 %v1637_v55  ;;  %v1480_v51 = vld [vmem:[#allocation7 + $0x150] sm:$0xf]  ;;  %v1321_v55 = vor.u32 %v1789_v50, %v1320_v49 }
  0x72   :  { %974 = vmatmul.bf16.vlgmr.msra.gmra.mxu0 %v2167_v18 }
  0x73   :  { %1022 = vmatpush.bf16.msrb.mxu0 %v1461_v52  ;;  %988 = vmatmul.bf16.vlgmr.msra.gmra.mxu1 %v2161_v58  ;;  %v1829_v52 = vld [vmem:[#allocation7 + $0x160] sm:$0xf0] }
  0x74   :  { %1036 = vmatpush.bf16.msrb.mxu1 %v1621_v53  ;;  %1002 = vmatmul.bf16.vlgmr.msra.gmra.mxu2 %v2164_v5  ;;  %v1640_v53 = vld [vmem:[#allocation7 + $0x290] sm:$0xf]  ;;  %v1481_v56 = vor.u32 %v1829_v52, %v1480_v51 }
  0x75   :  { %1050 = vmatpush.bf16.msrb.mxu2 %v1781_v54  ;;  %1016 = vmatmul.bf16.vlgmr.msra.gmra.mxu3 %v2167_v18  ;;  %v1869_v54 = vld [vmem:[#allocation7 + $0x2a0] sm:$0xf0] }
  0x76   :  { %v1641_v57 = vor.u32 %v1869_v54, %v1640_v53 }
  0x77   :  { %1023 = vmatpush.bf16.msrb.mxu0 %v1441_v63 }
  0x78   :  { %1037 = vmatpush.bf16.msrb.mxu1 %v1601_v0 }
  0x79   :  { %1051 = vmatpush.bf16.msrb.mxu2 %v1761_v1 }
  0x7b   :  { %1024 = vmatpush.bf16.msrb.mxu0 %v1421_v9 }
  0x7c   :  { %1038 = vmatpush.bf16.msrb.mxu1 %v1581_v10 }
  0x7d   :  { %1052 = vmatpush.bf16.msrb.mxu2 %v1741_v11 }
  0x7f   :  { %1025 = vmatpush.bf16.msrb.mxu0 %v1401_v19 }
  0x80   :  { %1039 = vmatpush.bf16.msrb.mxu1 %v1561_v20 }
  0x81   :  { %1053 = vmatpush.bf16.msrb.mxu2 %v1721_v21 }
  0x83   :  { %1026 = vmatpush.bf16.msrb.mxu0 %v1381_v28 }
  0x84   :  { %1040 = vmatpush.bf16.msrb.mxu1 %v1541_v29 }
  0x85   :  { %1054 = vmatpush.bf16.msrb.mxu2 %v1701_v30 }
  0x87   :  { %1027 = vmatpush.bf16.msrb.mxu0 %v1361_v37 }
  0x88   :  { %1041 = vmatpush.bf16.msrb.mxu1 %v1521_v38 }
  0x89   :  { %1055 = vmatpush.bf16.msrb.mxu2 %v1681_v39 }
  0x8b   :  { %1028 = vmatpush.bf16.msrb.mxu0 %v1341_v46 }
  0x8c   :  { %1042 = vmatpush.bf16.msrb.mxu1 %v1501_v47 }
  0x8d   :  { %1056 = vmatpush.bf16.msrb.mxu2 %v1661_v48 }
  0x8f   :  { %1029 = vmatpush.bf16.msrb.mxu0 %v1321_v55 }
  0x90   :  { %1043 = vmatpush.bf16.msrb.mxu1 %v1481_v56 }
  0x91   :  { %1057 = vmatpush.bf16.msrb.mxu2 %v1641_v57 }
  0x92   :  { %1030 = vmatmul.bf16.vlgmr.msrb.gmra.mxu0 %v2161_v58 }
  0x93   :  { %1044 = vmatmul.bf16.vlgmr.msrb.gmra.mxu1 %v2164_v5 }
  0x94   :  { %1058 = vmatmul.bf16.vlgmr.msrb.gmra.mxu2 %v2167_v18 }
  0xaf   :  { %v863_v59 = vpop.f32.mrf.mxu0 }
  0xb0   :  { %v877_v60 = vpop.f32.mrf.mxu1 }
  0xb1   :  { %v878_v0 = vadd.f32 %v877_v60, %v863_v59 }
  0xb7   :  { %v865_v61 = vpop.f32.mrf.mxu0  ;;  %v905_v63 = vpop.f32.mrf.mxu3 }
  0xb8   :  { %v879_v62 = vpop.f32.mrf.mxu1 }
  0xb9   :  { %v891_v1 = vpop.f32.mrf.mxu2  ;;  %v880_v10 = vadd.f32 %v879_v62, %v865_v61 }
  0xba   :  { %v892_v3 = vadd.f32 %v891_v1, %v878_v0 }
  0xbf   :  { %v907_v9 = vpop.f32.mrf.mxu3 }
  0xc1   :  { %v893_v5 = vpop.f32.mrf.mxu2 }
  0xc2   :  { %v894_v19 = vadd.f32 %v893_v5, %v880_v10  ;;  %v2121_v5 = vmov 1065369472  }
  0xcf   :  { %v919_v2 = vpop.f32.mrf.mxu0 }
  0xd0   :  { %v920_v4 = vadd.f32 %v919_v2, %v905_v63  ;;  %v933_v6 = vpop.f32.mrf.mxu1 }
  0xd2   :  { %v934_v7 = vadd.f32 %v933_v6, %v920_v4 }
  0xd4   :  { %v1064_v8 = vpack.c.bf16 %v934_v7, %v892_v3 }
  0xd6   :  { %v1070_v58 = vxor.u32 2147516416, %v1064_v8  ;;  %v1104_v11 = vrot.slane %v1064_v8, 4 }
  0xd7   :  { %v921_v12 = vpop.f32.mrf.mxu0  ;;  %v947_v25 = vpop.f32.mrf.mxu2 }
  0xd8   :  { %v1072_v18 = vunpack.c.l.bf16 %v1070_v58  ;;  %v1108_v13 = vxor.u32 2147516416, %v1104_v11  ;;  %v922_v14 = vadd.f32 %v921_v12, %v907_v9  ;;  %v935_v15 = vpop.f32.mrf.mxu1  ;;  %v2182_v12 = vunpack.c.h.bf16 %v2121_v5 }
  0xd9   :  { %v961_v28 = vpop.f32.mrf.mxu3 }
  0xda   :  { %v1074_v16 = vmul.f32 1.442695, %v1072_v18  ;;  %v1110_v17 = vunpack.c.l.bf16 %v1108_v13  ;;  %v936_v20 = vadd.f32 %v935_v15, %v922_v14  ;;  %v962_v60 = vadd.f32 %v961_v28, %v947_v25 }
  0xdb   :  { %v2184_v18 = vunpack.c.l.bf16 %v2121_v5 }
  0xdc   :  { %1928 = vpow2.f32 %v1074_v16  ;;  %v1112_v21 = vmul.f32 1.442695, %v1110_v17  ;;  %v1067_v22 = vpack.c.bf16 %v936_v20, %v894_v19 }
  0xde   :  { %1930 = vpow2.f32 %v1112_v21  ;;  %v1071_v23 = vxor.u32 2147516416, %v1067_v22  ;;  %v1105_v24 = vrot.slane %v1067_v22, 4 }
  0xdf   :  { %v949_v40 = vpop.f32.mrf.mxu2 }
  0xe0   :  { %v1073_v26 = vunpack.c.l.bf16 %v1071_v23  ;;  %v1109_v27 = vxor.u32 2147516416, %v1105_v24 }
  0xe1   :  { %v963_v44 = vpop.f32.mrf.mxu3 }
  0xe2   :  { %v1929_v29 = vpop.eup %1928  ;;  %v1076_v30 = vmul.f32 1.442695, %v1073_v26  ;;  %v1111_v31 = vunpack.c.l.bf16 %v1109_v27  ;;  %v964_v14 = vadd.f32 %v963_v44, %v949_v40 }
  0xe3   :  { %v1078_v32 = vpack.c.bf16 %v1929_v29, %v1929_v29 }
  0xe4   :  { %v1931_v33 = vpop.eup %1930  ;;  %1932 = vpow2.f32 %v1076_v30  ;;  %v1114_v34 = vmul.f32 1.442695, %v1111_v31 }
  0xe5   :  { %v1080_v35 = vunpack.c.l.bf16 %v1078_v32  ;;  %v1116_v36 = vpack.c.bf16 %v1931_v33, %v1931_v33 }
  0xe6   :  { %1934 = vpow2.f32 %v1114_v34 }
  0xe7   :  { %v1118_v37 = vunpack.c.l.bf16 %v1116_v36  ;;  %v1082_v38 = vadd.f32 1.0, %v1080_v35 }
  0xe9   :  { %v1120_v39 = vadd.f32 1.0, %v1118_v37  ;;  %v1084_v46 = vpack.c.bf16 %v1082_v38, %v1082_v38 }
  0xea   :  { %v1933_v41 = vpop.eup %1932 }
  0xeb   :  { %v1122_v42 = vpack.c.bf16 %v1120_v39, %v1120_v39  ;;  %v1079_v43 = vpack.c.bf16 %v1933_v41, %v1933_v41  ;;  %v1088_v53 = vunpack.c.h.bf16 %v1084_v46  ;;  %v1089_v55 = vunpack.c.l.bf16 %v1084_v46  ;;  %v1212_v46 = vld [vmem:[#allocation5] sm:$0xff] }
  0xec   :  { %v1935_v45 = vpop.eup %1934 }
  0xed   :  { %v1081_v47 = vunpack.c.l.bf16 %v1079_v43  ;;  %v1124_v48 = vunpack.c.h.bf16 %v1122_v42  ;;  %v1117_v49 = vpack.c.bf16 %v1935_v45, %v1935_v45  ;;  %v1125_v50 = vunpack.c.l.bf16 %v1122_v42 }
  0xef   :  { %v1083_v51 = vadd.f32 1.0, %v1081_v47  ;;  %v1119_v54 = vunpack.c.l.bf16 %v1117_v49  ;;  %v975_v56 = vpop.f32.mrf.mxu0  ;;  %1936 = vrcp.f32 %v1124_v48 }
  0xf0   :  { %v989_v52 = vpop.f32.mrf.mxu1  ;;  %1938 = vrcp.f32 %v1125_v50  ;;  %v976_v4 = vadd.f32 %v975_v56, %v962_v60 }
  0xf1   :  { %v1121_v57 = vadd.f32 1.0, %v1119_v54  ;;  %v1085_v59 = vpack.c.bf16 %v1083_v51, %v1083_v51  ;;  %1940 = vrcp.f32 %v1088_v53 }
  0xf2   :  { %1942 = vrcp.f32 %v1089_v55 }
  0xf3   :  { %v1123_v62 = vpack.c.bf16 %v1121_v57, %v1121_v57  ;;  %v1095_v3 = vunpack.c.h.bf16 %v1085_v59  ;;  %v1096_v8 = vunpack.c.l.bf16 %v1085_v59 }
  0xf5   :  { %v1131_v1 = vunpack.c.h.bf16 %v1123_v62  ;;  %v1132_v2 = vunpack.c.l.bf16 %v1123_v62  ;;  %v1937_v7 = vpop.eup %1936 }
  0xf6   :  { %v1939_v9 = vpop.eup %1938  ;;  %v1127_v20 = vmul.f32 %v1937_v7, %v2182_v12 }
  0xf7   :  { %v1003_v61 = vpop.f32.mrf.mxu2  ;;  %1944 = vrcp.f32 %v1131_v1  ;;  %v1941_v11 = vpop.eup %1940  ;;  %v1129_v21 = vmul.f32 %v1939_v9, %v2184_v18 }
  0xf8   :  { %v1004_v63 = vadd.f32 %v1003_v61, %v989_v52  ;;  %v1017_v0 = vpop.f32.mrf.mxu3  ;;  %v991_v58 = vpop.f32.mrf.mxu1  ;;  %1946 = vrcp.f32 %v1132_v2  ;;  %v1091_v26 = vmul.f32 %v1941_v11, %v2182_v12 }
  0xf9   :  { %v1943_v13 = vpop.eup %1942  ;;  %1948 = vrcp.f32 %v1095_v3  ;;  %v977_v15 = vpop.f32.mrf.mxu0  ;;  %v1130_v31 = vpack.c.bf16 %v1127_v20, %v1129_v21 }
  0xfa   :  { %v1018_v6 = vadd.f32 %v1017_v0, %v1004_v63  ;;  %1950 = vrcp.f32 %v1096_v8  ;;  %v978_v25 = vadd.f32 %v977_v15, %v964_v14  ;;  %v1093_v27 = vmul.f32 %v1943_v13, %v2184_v18  ;;  %v1213_v0 = vld [vmem:[#allocation5 + $0x8] sm:$0xff] }
  0xfb   :  { %v1210_v43 = vunpack.c.l.bf16 %v1130_v31 }
  0xfc   :  { %v1065_v10 = vpack.c.bf16 %v1018_v6, %v976_v4  ;;  %v1094_v36 = vpack.c.bf16 %v1091_v26, %v1093_v27 }
  0xfd   :  { %v1945_v29 = vpop.eup %1944  ;;  %v1214_v53 = vmul.f32 %v1212_v46, %v1210_v43 }
  0xfe   :  { %v1138_v16 = vunpack.c.l.bf16 %v1065_v10  ;;  %v1146_v17 = vrot.slane %v1065_v10, 4  ;;  %v1947_v30 = vpop.eup %1946  ;;  %v1134_v40 = vmul.f32 %v1945_v29, %v2182_v12  ;;  %v1216_v49 = vunpack.c.l.bf16 %v1094_v36 }
  0xff   :  { %v1005_v19 = vpop.f32.mrf.mxu2  ;;  %v1949_v33 = vpop.eup %1948  ;;  %v1136_v41 = vmul.f32 %v1947_v30, %v2184_v18 }
 0x100   :  { %v1006_v22 = vadd.f32 %v1005_v19, %v991_v58  ;;  %1952 = vtanh.f32 %v1138_v16  ;;  %v1150_v23 = vxor.u32 2147516416, %v1146_v17  ;;  %v1019_v24 = vpop.f32.mrf.mxu3  ;;  %v1951_v35 = vpop.eup %1950  ;;  %v1098_v47 = vmul.f32 %v1949_v33, %v2182_v12 }
 0x101   :  { %v1100_v48 = vmul.f32 %v1951_v35, %v2184_v18  ;;  %v1137_v51 = vpack.c.bf16 %v1134_v40, %v1136_v41 }
 0x102   :  { %v1020_v28 = vadd.f32 %v1019_v24, %v1006_v22  ;;  %v1152_v34 = vunpack.c.l.bf16 %v1150_v23 }
 0x103   :  { %v1101_v55 = vpack.c.bf16 %v1098_v47, %v1100_v48  ;;  %v1211_v61 = vunpack.c.l.bf16 %v1137_v51 }
 0x104   :  { %v1068_v32 = vpack.c.bf16 %v1020_v28, %v978_v25  ;;  %v1154_v45 = vmul.f32 1.442695, %v1152_v34 }
 0x105   :  { %v1217_v1 = vunpack.c.l.bf16 %v1101_v55  ;;  %v1215_v6 = vmul.f32 %v1213_v0, %v1211_v61 }
 0x106   :  { %v1139_v37 = vunpack.c.l.bf16 %v1068_v32  ;;  %v1147_v38 = vrot.slane %v1068_v32, 4  ;;  %v1953_v39 = vpop.eup %1952 }
 0x107   :  { %v1142_v42 = vpack.c.bf16 %v1953_v39, %v1953_v39 }
 0x108   :  { %1954 = vtanh.f32 %v1139_v37  ;;  %v1151_v44 = vxor.u32 2147516416, %v1147_v38 }
 0x109   :  { %v1218_v50 = vunpack.c.l.bf16 %v1142_v42  ;;  %1956 = vpow2.f32 %v1154_v45 }
 0x10a   :  { %v1153_v52 = vunpack.c.l.bf16 %v1151_v44 }
 0x10b   :  { %v1220_v54 = vmul.f32 %v1218_v50, %v1216_v49 }
 0x10c   :  { %v1156_v60 = vmul.f32 1.442695, %v1153_v52 }
 0x10d   :  { %v1222_v57 = vadd.f32 %v1220_v54, %v1214_v53 }
 0x10e   :  { %v1955_v56 = vpop.eup %1954  ;;  %1958 = vpow2.f32 %v1156_v60 }
 0x10f   :  { %v1143_v59 = vpack.c.bf16 %v1955_v56, %v1955_v56  ;;  %v1031_v62 = vpop.f32.mrf.mxu0  ;;  %1250 = vst [vmem:[#allocation9] sm:$0xff] %v1222_v57  ;;  %v1957_v4 = vpop.eup %1956  ;;  %v1224_v35 = vpack.c.bf16 %v1222_v57, %v1222_v57 }
 0x110   :  { %v1045_v63 = vpop.f32.mrf.mxu1  ;;  %v1158_v10 = vpack.c.bf16 %v1957_v4, %v1957_v4 }
 0x111   :  { %v1219_v2 = vunpack.c.l.bf16 %v1143_v59  ;;  %v1046_v3 = vadd.f32 %v1045_v63, %v1031_v62  ;;  %v1226_v39 = vunpack.c.l.bf16 %v1224_v35 }
 0x112   :  { %v1160_v15 = vunpack.c.l.bf16 %v1158_v10 }
 0x113   :  { %v1221_v7 = vmul.f32 %v1219_v2, %v1217_v1 }
 0x114   :  { %v1959_v5 = vpop.eup %1958  ;;  %v1162_v22 = vadd.f32 1.0, %v1160_v15 }
 0x115   :  { %v1223_v8 = vadd.f32 %v1221_v7, %v1215_v6  ;;  %v1159_v17 = vpack.c.bf16 %v1959_v5, %v1959_v5 }
 0x116   :  { %v1164_v27 = vpack.c.bf16 %v1162_v22, %v1162_v22 }
 0x117   :  { %v1059_v9 = vpop.f32.mrf.mxu2  ;;  %1251 = vst [vmem:[#allocation9 + $0x8] sm:$0xff] %v1223_v8  ;;  %v1033_v13 = vpop.f32.mrf.mxu0  ;;  %v1161_v25 = vunpack.c.l.bf16 %v1159_v17  ;;  %v1225_v47 = vpack.c.bf16 %v1223_v8, %v1223_v8 }
 0x118   :  { %v1060_v58 = vadd.f32 %v1059_v9, %v1046_v3  ;;  %1277 = dma.vmem_to_hbm [thread:$0]  %s1270_s8, 256, %s1272_s11, [#allocation10], %s2113_s23, %s2113_s23, %s2114_s24   ;;  %v1047_v14 = vpop.f32.mrf.mxu1  ;;  %v1166_v31 = vunpack.c.h.bf16 %v1164_v27  ;;  %v1167_v34 = vunpack.c.l.bf16 %v1164_v27 }
 0x119   :  { %v1048_v20 = vadd.f32 %v1047_v14, %v1033_v13  ;;  %v1163_v29 = vadd.f32 1.0, %v1161_v25  ;;  %v1227_v53 = vunpack.c.l.bf16 %v1225_v47 }
 0x11a   :  { %v1066_v11 = vpack.c.bf16 %v1060_v58, %v1060_v58 }
 0x11b   :  { %v1165_v36 = vpack.c.bf16 %v1163_v29, %v1163_v29 }
 0x11c   :  { %v1180_v16 = vxor.u32 2147516416, %v1066_v11 }
 0x11d   :  { %v1173_v40 = vunpack.c.h.bf16 %v1165_v36  ;;  %v1174_v42 = vunpack.c.l.bf16 %v1165_v36 }
 0x11e   :  { %v1182_v19 = vunpack.c.l.bf16 %v1180_v16 }
 0x11f   :  { %v1061_v21 = vpop.f32.mrf.mxu2 }
 0x120   :  { %v1184_v23 = vmul.f32 1.442695, %v1182_v19  ;;  %v1062_v24 = vadd.f32 %v1061_v21, %v1048_v20 }
 0x122   :  { %v1069_v26 = vpack.c.bf16 %v1062_v24, %v1062_v24  ;;  %1960 = vpow2.f32 %v1184_v23 }
 0x124   :  { %v1181_v28 = vxor.u32 2147516416, %v1069_v26 }
 0x126   :  { %v1183_v30 = vunpack.c.l.bf16 %v1181_v28 }
 0x128   :  { %v1186_v32 = vmul.f32 1.442695, %v1183_v30  ;;  %v1961_v33 = vpop.eup %1960 }
 0x129   :  { %v1188_v37 = vpack.c.bf16 %v1961_v33, %v1961_v33 }
 0x12a   :  { %1962 = vpow2.f32 %v1186_v32 }
 0x12b   :  { %1964 = vrcp.f32 %v1166_v31  ;;  %v1190_v38 = vunpack.c.l.bf16 %v1188_v37 }
 0x12c   :  { %1966 = vrcp.f32 %v1167_v34 }
 0x12d   :  { %v1192_v41 = vadd.f32 1.0, %v1190_v38  ;;  %1968 = vtanh.f32 %v1226_v39 }
 0x12e   :  { %1970 = vrcp.f32 %v1173_v40 }
 0x12f   :  { %v1194_v44 = vpack.c.bf16 %v1192_v41, %v1192_v41  ;;  %1972 = vrcp.f32 %v1174_v42 }
 0x130   :  { %v1963_v43 = vpop.eup %1962 }
 0x131   :  { %v1189_v45 = vpack.c.bf16 %v1963_v43, %v1963_v43  ;;  %v1965_v46 = vpop.eup %1964  ;;  %v1196_v48 = vunpack.c.h.bf16 %v1194_v44  ;;  %v1197_v49 = vunpack.c.l.bf16 %v1194_v44 }
 0x132   :  { %v1967_v50 = vpop.eup %1966  ;;  %v1169_v54 = vmul.f32 %v1965_v46, %v2182_v12 }
 0x133   :  { %v1191_v51 = vunpack.c.l.bf16 %v1189_v45  ;;  %1974 = vrcp.f32 %v1196_v48  ;;  %v1171_v55 = vmul.f32 %v1967_v50, %v2184_v18  ;;  %v1969_v56 = vpop.eup %1968 }
 0x134   :  { %1976 = vrcp.f32 %v1197_v49  ;;  %v1971_v59 = vpop.eup %1970  ;;  %v1230_v4 = vpack.c.bf16 %v1969_v56, %v1969_v56 }
 0x135   :  { %v1193_v52 = vadd.f32 1.0, %v1191_v51  ;;  %v1973_v60 = vpop.eup %1972  ;;  %v1172_v0 = vpack.c.bf16 %v1169_v54, %v1171_v55  ;;  %1978 = vtanh.f32 %v1227_v53  ;;  %v1176_v6 = vmul.f32 %v1971_v59, %v2182_v12 }
 0x136   :  { %v1178_v7 = vmul.f32 %v1973_v60, %v2184_v18  ;;  %v1234_v58 = vunpack.c.l.bf16 %v1230_v4 }
 0x137   :  { %v1195_v57 = vpack.c.bf16 %v1193_v52, %v1193_v52  ;;  %v1232_v9 = vunpack.c.l.bf16 %v1172_v0 }
 0x138   :  { %v1179_v13 = vpack.c.bf16 %v1176_v6, %v1178_v7 }
 0x139   :  { %v1203_v61 = vunpack.c.h.bf16 %v1195_v57  ;;  %v1204_v62 = vunpack.c.l.bf16 %v1195_v57  ;;  %v1975_v63 = vpop.eup %1974  ;;  %v1236_v16 = vmul.f32 %v1234_v58, %v1232_v9 }
 0x13a   :  { %v1977_v1 = vpop.eup %1976  ;;  %v1199_v2 = vmul.f32 %v1975_v63, %v2182_v12  ;;  %v1233_v23 = vunpack.c.l.bf16 %v1179_v13 }
 0x13b   :  { %1980 = vrcp.f32 %v1203_v61  ;;  %v1201_v3 = vmul.f32 %v1977_v1, %v2184_v18  ;;  %v1979_v10 = vpop.eup %1978 }
 0x13c   :  { %1982 = vrcp.f32 %v1204_v62  ;;  %v1231_v20 = vpack.c.bf16 %v1979_v10, %v1979_v10 }
 0x13d   :  { %v1202_v8 = vpack.c.bf16 %v1199_v2, %v1201_v3 }
 0x13e   :  { %v1235_v24 = vunpack.c.l.bf16 %v1231_v20 }
 0x13f   :  { %v1240_v11 = vunpack.c.l.bf16 %v1202_v8 }
 0x140   :  { %v1237_v26 = vmul.f32 %v1235_v24, %v1233_v23 }
 0x141   :  { %v1981_v5 = vpop.eup %1980  ;;  %v1242_v17 = vmul.f32 %v1240_v11, %v1234_v58 }
 0x142   :  { %v1983_v14 = vpop.eup %1982  ;;  %v1206_v15 = vmul.f32 %v1981_v5, %v2182_v12 }
 0x143   :  { %v1208_v19 = vmul.f32 %v1983_v14, %v2184_v18  ;;  %v1908_v21 = vpack.c.bf16 %v1242_v17, %v1236_v16 }
 0x145   :  { %v1209_v22 = vpack.c.bf16 %v1206_v15, %v1208_v19  ;;  %1909 = vst [vmem:[#allocation8] sm:$0xff] %v1908_v21  }
 0x147   :  { %v1241_v25 = vunpack.c.l.bf16 %v1209_v22 }
 0x149   :  { %v1243_v27 = vmul.f32 %v1241_v25, %v1235_v24 }
 0x14b   :  { %v1913_v12 = vpack.c.bf16 %v1243_v27, %v1237_v26 }
 0x14d   :  { %1915 = vst [vmem:[#allocation8 + $0x8] sm:$0xff] %v1913_v12  }
 0x14e   :  { %1264 = dma.vmem_to_hbm [thread:$0]  %s1257_s12, 256, %s1259_s15, [#allocation4], %s2113_s23, %s2113_s23, %s2114_s24  }
 0x14f   :  { %2108 = dma.done.wait [#allocation4], 256  }
 0x150   :  { %2109 = vsyncadd [#allocation4], 4294967040 }
 0x151   :  { %2110 = dma.done.wait [#allocation10], 256  }
 0x152   :  { %2111 = vsyncadd [#allocation10], 4294967040 }
 0x153   :  { %1286 = vsyncpa [#allocation3], 1 }
 0x154   :  { %1287 = vsyncpa [#allocation6], 1 }
 0x155   :  { %1288 = vsyncpa [#allocation4], 1 }
 0x156   :  { %1289 = vsyncpa [#allocation10], 1 }

</bundles_post_ra>
